<compile_context>
chip_gen: v7x
topology: tpu7x:2x2x1
jax: 0.10.0
libtpu: 0.0.40
codegen_flags: <defaults>
</compile_context>

<pallas_src>
import functools

import jax
import jax.numpy as jnp
from jax.experimental import pallas as pl
from jax.experimental.pallas import tpu as pltpu


def swiglu_kernel(x_ref, wh_ref, wg_ref, w2_ref, b2_ref, o_ref, acc_ref):
    # x_ref:  (tm, D)   tile of tokens
    # wh_ref: (D, th)   "hidden" half of W1 (column tile of the full (D, 2H) array)
    # wg_ref: (D, th)   "gate"   half of W1 (column tile of the full (D, 2H) array)
    # w2_ref: (th, D)   row tile of W2 (transposed)
    # b2_ref: (1, D)    to_out bias
    # o_ref:  (tm, D)   output tile (resident across the H grid axis)
    # acc_ref:(tm, D)   f32 accumulator scratch
    h = pl.program_id(1)

    @pl.when(h == 0)
    def _init():
        acc_ref[...] = jnp.zeros_like(acc_ref)

    x = x_ref[...]
    hidden = jnp.dot(x, wh_ref[...], preferred_element_type=jnp.float32)  # (tm, th)
    gate = jnp.dot(x, wg_ref[...], preferred_element_type=jnp.float32)    # (tm, th)
    act = gate * jax.nn.sigmoid(gate) * hidden                            # silu(gate)*hidden
    acc_ref[...] += jnp.dot(act.astype(w2_ref.dtype), w2_ref[...],
                            preferred_element_type=jnp.float32)

    @pl.when(h == pl.num_programs(1) - 1)
    def _finalize():
        o_ref[...] = (acc_ref[...] + b2_ref[...]).astype(o_ref.dtype)


def _round_up(a, b):
    return pl.cdiv(a, b) * b


def _pick_hidden_tile(H, th_max):
    """Largest multiple-of-128 divisor of H that is <= th_max; else full H."""
    best = None
    t = 128
    while t <= min(H, th_max):
        if H % t == 0:
            best = t
        t += 128
    return best if best is not None else H


def swiglu_forward(x, w1_t, w2_t, b2, *, tm=256, th=512):
    """x: (B, S, D); w1_t: (D, 2H); w2_t: (H, D); b2: (D,). Returns (B, S, D)."""
    B, S, D = x.shape
    H2 = w1_t.shape[1]
    H = H2 // 2
    M = B * S

    # ---- tile-size selection ------------------------------------------------
    # Token tile: multiple of 8 (sublanes); clamp for tiny M, then pad M up.
    tm = min(tm, _round_up(M, 8))
    tm = max(8, (tm // 8) * 8)
    M_pad = _round_up(M, tm)

    # Hidden tile: must divide H and be a multiple of 128, or be the full extent.
    th = _pick_hidden_tile(H, th)
    n_h = H // th

    # ---- operand preparation ------------------------------------------------
    x2d = x.reshape(M, D)
    if M_pad != M:
        x2d = jnp.pad(x2d, ((0, M_pad - M), (0, 0)))
    b2_2d = b2.reshape(1, D)

    grid = (M_pad // tm, n_h)

    # W1 is passed twice; the index maps select the "hidden" tile (block h) and
    # the "gate" tile (block n_h + h), since torch.chunk puts hidden first.
    w1_hidden_spec = pl.BlockSpec((D, th), lambda i, h: (0, h))
    w1_gate_spec = pl.BlockSpec((D, th), lambda i, h: (0, n_h + h))

    # ---- VMEM budget (double-buffered tiles + f32 accumulator) --------------
    itemsize = x.dtype.itemsize
    vmem_bytes = 2 * (tm * D + 2 * D * th + th * D + D) * itemsize   # dbl-buffered ins
    vmem_bytes += 2 * tm * D * itemsize                              # output tile
    vmem_bytes += tm * D * 4                                         # f32 accumulator
    vmem_limit = min(max(int(vmem_bytes * 1.5), 16 << 20), 100 << 20)

    cost = pl.CostEstimate(
        flops=6 * M_pad * D * H,                 # 2*M*D*2H (W1) + 2*M*H*D (W2)
        transcendentals=M_pad * H,               # sigmoid
        bytes_accessed=(x2d.size + w1_t.size + w2_t.size + b2.size
                        + M_pad * D) * itemsize,
    )

    out2d = pl.pallas_call(
        swiglu_kernel,
        out_shape=jax.ShapeDtypeStruct((M_pad, D), x.dtype),
        grid_spec=pltpu.PrefetchScalarGridSpec(
            num_scalar_prefetch=0,
            grid=grid,
            in_specs=[
                pl.BlockSpec((tm, D), lambda i, h: (i, 0)),   # x tile
                w1_hidden_spec,                               # W1 "hidden" column tile
                w1_gate_spec,                                 # W1 "gate" column tile
                pl.BlockSpec((th, D), lambda i, h: (h, 0)),   # W2 row tile
                pl.BlockSpec((1, D), lambda i, h: (0, 0)),    # bias
            ],
            out_specs=pl.BlockSpec((tm, D), lambda i, h: (i, 0)),
            scratch_shapes=[pltpu.VMEM((tm, D), jnp.float32)],
        ),
        compiler_params=pltpu.CompilerParams(
            dimension_semantics=("parallel", "arbitrary"),
            vmem_limit_bytes=vmem_limit,
        ),
        cost_estimate=cost,
    )(x2d, w1_t, w1_t, w2_t, b2_2d)

    return out2d[:M].reshape(B, S, D)


def swiglu_ref(x, w1_t, w2_t, b2):
    h_full = jnp.einsum("bsd,dh->bsh", x, w1_t).astype(jnp.float32)
    H = h_full.shape[-1] // 2
    hidden, gate = h_full[..., :H], h_full[..., H:]
    act = (gate * jax.nn.sigmoid(gate) * hidden).astype(x.dtype)
    return jnp.einsum("bsh,hd->bsd", act, w2_t).astype(jnp.float32) + b2


if __name__ == "__main__":
    key = jax.random.PRNGKey(0)
    B, S, D, H = 2, 8, 128, 128   # dim=128, hidden_dim=128

    k_x, k_w1, k_w2, k_b2 = jax.random.split(key, 4)
    x = jax.random.normal(k_x, (B, S, D), dtype=jnp.float32)
    # Deterministic "Linear" parameter init (uniform ~ 1/sqrt(fan_in)), synthetic.
    w1_t = jax.random.uniform(k_w1, (D, 2 * H), dtype=jnp.float32,
                              minval=-1.0, maxval=1.0) / jnp.sqrt(D)
    w2_t = jax.random.uniform(k_w2, (H, D), dtype=jnp.float32,
                              minval=-1.0, maxval=1.0) / jnp.sqrt(H)
    b2 = jax.random.uniform(k_b2, (D,), dtype=jnp.float32,
                            minval=-1.0, maxval=1.0) / jnp.sqrt(H)

    fwd = jax.jit(functools.partial(swiglu_forward))
    out = fwd(x, w1_t, w2_t, b2)
    out = jax.block_until_ready(out)

    ref = swiglu_ref(x, w1_t, w2_t, b2).astype(out.dtype)
    assert out.shape == (B, S, D)
    assert jnp.allclose(out, ref, atol=1e-4, rtol=1e-4)
    print("KERNEL_OK")
</pallas_src>

<mosaic_0001>
module attributes {stable_mosaic.version = 11 : i64} {
  func.func @swiglu_kernel(%arg0: i32, %arg1: i32, %arg2: memref<16x128xf32, #tpu.memory_space<vmem>>, %arg3: memref<128x128xf32, #tpu.memory_space<vmem>>, %arg4: memref<128x128xf32, #tpu.memory_space<vmem>>, %arg5: memref<128x128xf32, #tpu.memory_space<vmem>>, %arg6: memref<1x128xf32, #tpu.memory_space<vmem>>, %arg7: memref<16x128xf32, #tpu.memory_space<vmem>>, %arg8: memref<16x128xf32, #tpu.memory_space<vmem>>) attributes {dimension_semantics = [#tpu.dimension_semantics<parallel>, #tpu.dimension_semantics<arbitrary>], iteration_bounds = array<i64: 1, 1>, scalar_prefetch = 0 : i64, scratch_operands = 1 : i64, tpu.core_type = #tpu.core_type<tc>, window_params = [{transform_indices = @transform_0, window_bounds = array<i64: 16, 128>}, {transform_indices = @transform_1, window_bounds = array<i64: 128, 128>}, {transform_indices = @transform_2, window_bounds = array<i64: 128, 128>}, {transform_indices = @transform_3, window_bounds = array<i64: 128, 128>}, {pipeline_mode = #tpu.pipeline_mode<synchronous>, transform_indices = @transform_4, window_bounds = array<i64: 1, 128>}, {transform_indices = @transform_5, window_bounds = array<i64: 16, 128>}]} {
    %c0_i32 = arith.constant 0 : i32
    %0 = arith.cmpi eq, %arg1, %c0_i32 : i32
    %1 = arith.extui %0 : i1 to i32
    %c0_i32_0 = arith.constant 0 : i32
    %2 = arith.cmpi ne, %1, %c0_i32_0 : i32
    scf.if %2 {
      %cst_17 = arith.constant 0.000000e+00 : f32
      %23 = vector.broadcast %cst_17 : f32 to vector<16x128xf32>
      %c0_18 = arith.constant 0 : index
      %c0_19 = arith.constant 0 : index
      %24 = vector.load %arg8[%c0_18, %c0_19] : memref<16x128xf32, #tpu.memory_space<vmem>>, vector<16x128xf32>
      tpu.vector_store %arg8[%c0_18, %c0_19], %23 {strides = array<i32>} : memref<16x128xf32, #tpu.memory_space<vmem>>, vector<16x128xf32>,
    } else {
    }
    %c0 = arith.constant 0 : index
    %c0_1 = arith.constant 0 : index
    %3 = vector.load %arg2[%c0, %c0_1] : memref<16x128xf32, #tpu.memory_space<vmem>>, vector<16x128xf32>
    %c0_2 = arith.constant 0 : index
    %c0_3 = arith.constant 0 : index
    %4 = vector.load %arg3[%c0_2, %c0_3] : memref<128x128xf32, #tpu.memory_space<vmem>>, vector<128x128xf32>
    %cst = arith.constant dense<0.000000e+00> : vector<16x128xf32>
    %5 = tpu.matmul %3, %4, %cst {dimension_numbers = #tpu.dot_dimension_numbers<[1], [0], [0], [1], [0, 0, 1, 1], [], []>} : vector<16x128xf32>, vector<128x128xf32>, vector<16x128xf32> -> vector<16x128xf32>
    %c0_4 = arith.constant 0 : index
    %c0_5 = arith.constant 0 : index
    %6 = vector.load %arg4[%c0_4, %c0_5] : memref<128x128xf32, #tpu.memory_space<vmem>>, vector<128x128xf32>
    %cst_6 = arith.constant dense<0.000000e+00> : vector<16x128xf32>
    %7 = tpu.matmul %3, %6, %cst_6 {dimension_numbers = #tpu.dot_dimension_numbers<[1], [0], [0], [1], [0, 0, 1, 1], [], []>} : vector<16x128xf32>, vector<128x128xf32>, vector<16x128xf32> -> vector<16x128xf32>
    %8 = arith.negf %7 : vector<16x128xf32>
    %9 = math.exp %8 : vector<16x128xf32>
    %cst_7 = arith.constant 1.000000e+00 : f32
    %10 = vector.broadcast %cst_7 : f32 to vector<16x128xf32>
    %11 = arith.addf %10, %9 : vector<16x128xf32>
    %12 = arith.divf %10, %11 : vector<16x128xf32>
    %13 = arith.mulf %7, %12 : vector<16x128xf32>
    %14 = arith.mulf %13, %5 : vector<16x128xf32>
    %c0_8 = arith.constant 0 : index
    %c0_9 = arith.constant 0 : index
    %15 = vector.load %arg8[%c0_8, %c0_9] : memref<16x128xf32, #tpu.memory_space<vmem>>, vector<16x128xf32>
    %c0_10 = arith.constant 0 : index
    %c0_11 = arith.constant 0 : index
    %16 = vector.load %arg5[%c0_10, %c0_11] : memref<128x128xf32, #tpu.memory_space<vmem>>, vector<128x128xf32>
    %cst_12 = arith.constant dense<0.000000e+00> : vector<16x128xf32>
    %17 = tpu.matmul %14, %16, %cst_12 {dimension_numbers = #tpu.dot_dimension_numbers<[1], [0], [0], [1], [0, 0, 1, 1], [], []>} : vector<16x128xf32>, vector<128x128xf32>, vector<16x128xf32> -> vector<16x128xf32>
    %18 = arith.addf %15, %17 : vector<16x128xf32>
    %c0_13 = arith.constant 0 : index
    %c0_14 = arith.constant 0 : index
    %19 = vector.load %arg8[%c0_13, %c0_14] : memref<16x128xf32, #tpu.memory_space<vmem>>, vector<16x128xf32>
    tpu.vector_store %arg8[%c0_13, %c0_14], %18 {strides = array<i32>} : memref<16x128xf32, #tpu.memory_space<vmem>>, vector<16x128xf32>,
    %c0_i32_15 = arith.constant 0 : i32
    %20 = arith.cmpi eq, %arg1, %c0_i32_15 : i32
    %21 = arith.extui %20 : i1 to i32
    %c0_i32_16 = arith.constant 0 : i32
    %22 = arith.cmpi ne, %21, %c0_i32_16 : i32
    scf.if %22 {
      %c0_17 = arith.constant 0 : index
      %c0_18 = arith.constant 0 : index
      %23 = vector.load %arg8[%c0_17, %c0_18] : memref<16x128xf32, #tpu.memory_space<vmem>>, vector<16x128xf32>
      %c0_19 = arith.constant 0 : index
      %c0_20 = arith.constant 0 : index
      %24 = vector.load %arg6[%c0_19, %c0_20] : memref<1x128xf32, #tpu.memory_space<vmem>>, vector<1x128xf32>
      %25 = vector.broadcast %24 : vector<1x128xf32> to vector<16x128xf32>
      %26 = arith.addf %23, %25 : vector<16x128xf32>
      %c0_21 = arith.constant 0 : index
      %c0_22 = arith.constant 0 : index
      %27 = vector.load %arg7[%c0_21, %c0_22] : memref<16x128xf32, #tpu.memory_space<vmem>>, vector<16x128xf32>
      tpu.vector_store %arg7[%c0_21, %c0_22], %26 {strides = array<i32>} : memref<16x128xf32, #tpu.memory_space<vmem>>, vector<16x128xf32>,
    } else {
    }
    return
  }
  func.func @transform_0(%arg0: i32, %arg1: i32) -> (i32, i32) {
    %c0_i32 = arith.constant 0 : i32
    %c0_i32_0 = arith.constant 0 : i32
    return %arg0, %c0_i32 : i32, i32
  }
  func.func @transform_1(%arg0: i32, %arg1: i32) -> (i32, i32) {
    %c0_i32 = arith.constant 0 : i32
    %c0_i32_0 = arith.constant 0 : i32
    return %c0_i32, %arg1 : i32, i32
  }
  func.func @transform_2(%arg0: i32, %arg1: i32) -> (i32, i32) {
    %c1_i32 = arith.constant 1 : i32
    %0 = arith.addi %c1_i32, %arg1 : i32
    %c0_i32 = arith.constant 0 : i32
    %c0_i32_0 = arith.constant 0 : i32
    return %c0_i32, %0 : i32, i32
  }
  func.func @transform_3(%arg0: i32, %arg1: i32) -> (i32, i32) {
    %c0_i32 = arith.constant 0 : i32
    %c0_i32_0 = arith.constant 0 : i32
    return %arg1, %c0_i32 : i32, i32
  }
  func.func @transform_4(%arg0: i32, %arg1: i32) -> (i32, i32) {
    %c0_i32 = arith.constant 0 : i32
    %c0_i32_0 = arith.constant 0 : i32
    %c0_i32_1 = arith.constant 0 : i32
    return %c0_i32, %c0_i32_0 : i32, i32
  }
  func.func @transform_5(%arg0: i32, %arg1: i32) -> (i32, i32) {
    %c0_i32 = arith.constant 0 : i32
    %c0_i32_0 = arith.constant 0 : i32
    return %arg0, %c0_i32 : i32, i32
  }
}

</mosaic_0001>

<bundles_post_ra>
// kernel: swiglu_forward.1
= control target key start
LH: loop header
LB: loop body
LE: loop exit
PB: predicated region body
PF: predicated region fallthrough
CT: control target
= control target key end

     0   :  { %10 = vsyncpa [#allocation4], 0  ;;  %s946_s0 = inlined_call_operand.hbm [shape: f32[16,128], index: 0, kind: input, shape index: {}]   ;;  %s947_s1 = inlined_call_operand.hbm [shape: f32[128,256], index: 1, kind: input, shape index: {}, may-alias: {1,2}]   ;;  %s948_s2 = inlined_call_operand.hbm [shape: f32[128,256], index: 2, kind: input, shape index: {}, may-alias: {1,2}]   ;;  %s949_s3 = inlined_call_operand.hbm [shape: f32[128,128], index: 3, kind: input, shape index: {}]   ;;  %s950_s4 = inlined_call_operand.vmem [shape: f32[1,128], index: 4, kind: input, shape index: {}]   ;;  %s951_s5 = inlined_call_operand.hbm [shape: f32[16,128], index: 5, kind: output, shape index: {}]  }
   0x1   :  { %11 = vsyncpa [#allocation7], 0 }
   0x2   :  { %12 = vsyncpa [#allocation10], 0 }
   0x3   :  { %13 = vsyncpa [#allocation5], 0  ;;  %s814_s18 = smov [#allocation6]   ;;  %s815_s20 = smov [#allocation3]  }
   0x4   :  { %s31_s19 = sshll.u32 %s814_s18, 4  ;;  %s19_s21 = sshll.u32 %s815_s20, 4  ;;  %s32_s19 = int_to_ptr.vmem [resolvable:$true] %s31_s19  ;;  %s20_s21 = int_to_ptr.vmem [resolvable:$true] %s19_s21 }
   0x5   :  { %s693_s24 = scalar_lea.hbm %s947_s1, 2048  ;;  %s695_s29 = scalar_lea.hbm %s947_s1, 4096 }
   0x6   :  { %p694_p0 = scmp.ne.s32.totalorder %s947_s1, %s693_s24  ;;  %p696_p1 = scmp.lt.u32.totalorder %s695_s29, %s693_s24 }
   0x7   :  { %p697_p2 = scmp.lt.u32.totalorder %s693_s24, %s947_s1 }
   0x9   :  { %p698_p3 = por %p697_p2, %p696_p1 }
   0xb   :  { %p699_p4 = pnand %p698_p3, %p694_p0 }
   0xd   :  { %702 = shalt.err (!%p699_p4)
}
   0xe   :  { %s703_s7 = scalar_lea.vmem %s32_s19, 2048  ;;  %p708_p6 = scmp.lt.s32.totalorder %s32_s19, %s32_s19 }
   0xf   :  { %p704_p5 = scmp.ne.s32.totalorder %s32_s19, %s703_s7  ;;  %p709_p7 = scmp.lt.s32.totalorder %s703_s7, %s703_s7 }
  0x11   :  { %p710_p8 = por %p709_p7, %p708_p6 }
  0x13   :  { %p711_p9 = pnand %p710_p8, %p704_p5 }
  0x15   :  { %714 = shalt.err (!%p711_p9)
}
  0x16   :  { %s816_s8 = smov 256   ;;  %s817_s9 = smov 128  }
  0x17   :  { %s818_s10 = smov 8   ;;  %s873_s15 = scalar_lea.hbm %s948_s2, 128 }
  0x18   :  { %37 = dma.hbm_to_vmem [thread:$0]  %s947_s1, 2048, %s32_s19, [#allocation7], %s816_s8, %s817_s9, %s818_s10  }
  0x19   :  { %s715_s18 = scalar_lea.hbm %s946_s0, 256 }
  0x1a   :  { %p716_p10 = scmp.ne.s32.totalorder %s946_s0, %s715_s18  ;;  %p719_p11 = scmp.lt.u32.totalorder %s715_s18, %s946_s0 }
  0x1c   :  { %p721_p12 = pnand %p719_p11, %p716_p10 }
  0x1e   :  { %724 = shalt.err (!%p721_p12)
}
  0x1f   :  { %s725_s1 = scalar_lea.vmem %s20_s21, 256  ;;  %p730_p0 = scmp.lt.s32.totalorder %s20_s21, %s20_s21 }
  0x20   :  { %p726_p13 = scmp.ne.s32.totalorder %s20_s21, %s725_s1  ;;  %p731_p1 = scmp.lt.s32.totalorder %s725_s1, %s725_s1 }
  0x22   :  { %p732_p2 = por %p731_p1, %p730_p0 }
  0x24   :  { %p733_p3 = pnand %p732_p2, %p726_p13 }
  0x26   :  { %736 = shalt.err (!%p733_p3)
}
  0x27   :  { %25 = dma.hbm_to_vmem [thread:$0]  %s946_s0, 256, %s20_s21, [#allocation4], %s817_s9, %s817_s9, %s818_s10  }
  0x28   :  { %s819_s26 = smov [#allocation8]   ;;  %s820_s28 = smov [#allocation9]  }
  0x29   :  { %s46_s27 = sshll.u32 %s819_s26, 4  ;;  %s58_s29 = sshll.u32 %s820_s28, 4  ;;  %s47_s27 = int_to_ptr.vmem [resolvable:$true] %s46_s27  ;;  %s890_s29 = int_to_ptr.vmem [resolvable:$true] %s58_s29 }
  0x2a   :  { %s761_s7 = scalar_lea.hbm %s948_s2, 2176  ;;  %s739_s13 = scalar_lea.hbm %s948_s2, 4096 }
  0x2b   :  { %p738_p4 = scmp.ne.s32.totalorder %s873_s15, %s761_s7  ;;  %p740_p5 = scmp.lt.u32.totalorder %s873_s15, %s948_s2 }
  0x2c   :  { %p741_p6 = scmp.lt.u32.totalorder %s739_s13, %s761_s7  ;;  %p743_p8 = scmp.lt.u32.totalorder %s761_s7, %s873_s15 }
  0x2e   :  { %p742_p7 = por %p741_p6, %p740_p5 }
  0x30   :  { %p744_p9 = por %p743_p8, %p742_p7 }
  0x32   :  { %p745_p10 = pnand %p744_p9, %p738_p4 }
  0x34   :  { %748 = shalt.err (!%p745_p10)
}
  0x35   :  { %s749_s0 = scalar_lea.vmem %s47_s27, 2048  ;;  %p754_p12 = scmp.lt.s32.totalorder %s47_s27, %s47_s27 }
  0x36   :  { %p750_p11 = scmp.ne.s32.totalorder %s47_s27, %s749_s0  ;;  %p755_p13 = scmp.lt.s32.totalorder %s749_s0, %s749_s0 }
  0x38   :  { %p756_p0 = por %p755_p13, %p754_p12 }
  0x3a   :  { %p757_p1 = pnand %p756_p0, %p750_p11 }
  0x3c   :  { %760 = shalt.err (!%p757_p1)
}
  0x3d   :  { %52 = dma.hbm_to_vmem [thread:$0]  %s873_s15, 2048, %s47_s27, [#allocation7], %s816_s8, %s817_s9, %s818_s10  }
  0x3e   :  { %s762_s17 = scalar_lea.hbm %s949_s3, 2048 }
  0x3f   :  { %p763_p2 = scmp.ne.s32.totalorder %s949_s3, %s762_s17  ;;  %p766_p3 = scmp.lt.u32.totalorder %s762_s17, %s949_s3 }
  0x41   :  { %p768_p4 = pnand %p766_p3, %p763_p2 }
  0x43   :  { %771 = shalt.err (!%p768_p4)
}
  0x44   :  { %s772_s24 = scalar_lea.vmem %s890_s29, 2048  ;;  %p777_p6 = scmp.lt.s32.totalorder %s890_s29, %s890_s29 }
  0x45   :  { %p773_p5 = scmp.ne.s32.totalorder %s890_s29, %s772_s24  ;;  %p778_p7 = scmp.lt.s32.totalorder %s772_s24, %s772_s24 }
  0x47   :  { %p779_p8 = por %p778_p7, %p777_p6 }
  0x49   :  { %p780_p9 = pnand %p779_p8, %p773_p5 }
  0x4b   :  { %783 = shalt.err (!%p780_p9)
}
  0x4c   :  { %64 = dma.hbm_to_vmem [thread:$0]  %s949_s3, 2048, %s890_s29, [#allocation10], %s817_s9, %s817_s9, %s818_s10  }
  0x4d   :  { %806 = dma.done.wait [#allocation4], 256  }
  0x4e   :  { %807 = vsyncadd [#allocation4], 4294967040 }
  0x4f   :  { %808 = dma.done.wait [#allocation7], 4096  }
  0x50   :  { %809 = vsyncadd [#allocation7], 4294963200 }
  0x51   :  { %810 = dma.done.wait [#allocation10], 2048  }
  0x52   :  { %811 = vsyncadd [#allocation10], 4294965248  ;;  %v179_v0 = vld [vmem:[#allocation8] sm:$0xff]  ;;  %v180_v1 = vld [vmem:[#allocation8 + $0x8] sm:$0xff]  ;;  %s821_s19 = smov [#allocation11]  }
  0x53   :  { %v181_v2 = vld [vmem:[#allocation8 + $0x10] sm:$0xff]  ;;  %v613_v3 = vpack.c.bf16 %v180_v1, %v179_v0  ;;  %v182_v4 = vld [vmem:[#allocation8 + $0x18] sm:$0xff]  ;;  %v183_v6 = vld [vmem:[#allocation8 + $0x20] sm:$0xff]  ;;  %s404_s25 = sshll.u32 %s821_s19, 4  ;;  %s405_s25 = int_to_ptr.vmem [resolvable:$true] %s404_s25 }
  0x54   :  { %v617_v5 = vpack.c.bf16 %v182_v4, %v181_v2  ;;  %v184_v7 = vld [vmem:[#allocation8 + $0x28] sm:$0xff]  ;;  %v88_v8 = vld [vmem:[#allocation6] sm:$0xff]  ;;  %v185_v10 = vld [vmem:[#allocation8 + $0x30] sm:$0xff]  ;;  %s784_s26 = scalar_lea.vmem %s405_s25, 256  ;;  %p789_p11 = scmp.lt.s32.totalorder %s405_s25, %s405_s25 }
  0x55   :  { %614 = vmatprep.subr.bf16.mxu1 %v613_v3  ;;  %v621_v9 = vpack.c.bf16 %v184_v7, %v183_v6  ;;  %v186_v11 = vld [vmem:[#allocation8 + $0x38] sm:$0xff]  ;;  %v89_v12 = vld [vmem:[#allocation6 + $0x8] sm:$0xff]  ;;  %v90_v14 = vld [vmem:[#allocation6 + $0x10] sm:$0xff]  ;;  %p785_p10 = scmp.ne.s32.totalorder %s405_s25, %s784_s26  ;;  %p790_p12 = scmp.lt.s32.totalorder %s784_s26, %s784_s26 }
  0x56   :  { %616 = vmatpush3.bf16.msra.mxu1 %v613_v3  ;;  %v581_v13 = vpack.c.bf16 %v89_v12, %v88_v8  ;;  %v91_v15 = vld [vmem:[#allocation6 + $0x18] sm:$0xff]  ;;  %v86_v16 = vld [vmem:[#allocation3] sm:$0xff]  ;;  %v92_v18 = vld [vmem:[#allocation6 + $0x20] sm:$0xff]  ;;  %v625_v20 = vpack.c.bf16 %v186_v11, %v185_v10 }
  0x57   :  { %618 = vmatprep.subr.bf16.mxu1 %v617_v5  ;;  %v585_v17 = vpack.c.bf16 %v91_v15, %v90_v14  ;;  %543 = vmatprep.mubr.f32.mxu1 %v86_v16  ;;  %v93_v19 = vld [vmem:[#allocation6 + $0x28] sm:$0xff]  ;;  %v187_v21 = vld [vmem:[#allocation8 + $0x40] sm:$0xff]  ;;  %v94_v24 = vld [vmem:[#allocation6 + $0x30] sm:$0xff]  ;;  %p791_p13 = por %p790_p12, %p789_p11 }
  0x58   :  { %508 = vmatprep.mubr.f32.mxu0 %v86_v16  ;;  %582 = vmatprep.subr.bf16.mxu0 %v581_v13  ;;  %v188_v22 = vld [vmem:[#allocation8 + $0x48] sm:$0xff]  ;;  %v589_v23 = vpack.c.bf16 %v93_v19, %v92_v18  ;;  %v95_v25 = vld [vmem:[#allocation6 + $0x38] sm:$0xff]  ;;  %v189_v27 = vld [vmem:[#allocation8 + $0x50] sm:$0xff] }
  0x59   :  { %584 = vmatpush3.bf16.msra.mxu0 %v581_v13  ;;  %v629_v26 = vpack.c.bf16 %v188_v22, %v187_v21  ;;  %v190_v28 = vld [vmem:[#allocation8 + $0x58] sm:$0xff]  ;;  %v593_v29 = vpack.c.bf16 %v95_v25, %v94_v24  ;;  %v96_v30 = vld [vmem:[#allocation6 + $0x40] sm:$0xff]  ;;  %v97_v31 = vld [vmem:[#allocation6 + $0x48] sm:$0xff]  ;;  %p792_p0 = pnand %p791_p13, %p785_p10 }
  0x5a   :  { %620 = vmatpush3.bf16.msra.mxu1 %v617_v5  ;;  %586 = vmatprep.subr.bf16.mxu0 %v585_v17  ;;  %v633_v32 = vpack.c.bf16 %v190_v28, %v189_v27  ;;  %v191_v33 = vld [vmem:[#allocation8 + $0x60] sm:$0xff]  ;;  %v192_v34 = vld [vmem:[#allocation8 + $0x68] sm:$0xff]  ;;  %v597_v35 = vpack.c.bf16 %v97_v31, %v96_v30  ;;  %v98_v36 = vld [vmem:[#allocation6 + $0x50] sm:$0xff] }
  0x5b   :  { %622 = vmatprep.subr.bf16.mxu1 %v621_v9  ;;  %v99_v37 = vld [vmem:[#allocation6 + $0x58] sm:$0xff]  ;;  %v637_v38 = vpack.c.bf16 %v192_v34, %v191_v33  ;;  %v193_v39 = vld [vmem:[#allocation8 + $0x70] sm:$0xff]  ;;  %v100_v42 = vld [vmem:[#allocation6 + $0x60] sm:$0xff] }
  0x5c   :  { %v194_v40 = vld [vmem:[#allocation8 + $0x78] sm:$0xff]  ;;  %v601_v41 = vpack.c.bf16 %v99_v37, %v98_v36  ;;  %v101_v43 = vld [vmem:[#allocation6 + $0x68] sm:$0xff]  ;;  %v102_v46 = vld [vmem:[#allocation6 + $0x70] sm:$0xff] }
  0x5d   :  { %588 = vmatpush3.bf16.msra.mxu0 %v585_v17  ;;  %v641_v44 = vpack.c.bf16 %v194_v40, %v193_v39  ;;  %v605_v45 = vpack.c.bf16 %v101_v43, %v100_v42  ;;  %v103_v47 = vld [vmem:[#allocation6 + $0x78] sm:$0xff]  ;;  %v288_v50 = vld [vmem:[#allocation9] sm:$0xff]  ;;  %v289_v51 = vld [vmem:[#allocation9 + $0x8] sm:$0xff] }
  0x5e   :  { %624 = vmatpush3.bf16.msra.mxu1 %v621_v9  ;;  %590 = vmatprep.subr.bf16.mxu0 %v589_v23  ;;  %v609_v48 = vpack.c.bf16 %v103_v47, %v102_v46  ;;  %v87_v49 = vld [vmem:[#allocation3 + $0x8] sm:$0xff]  ;;  %v645_v52 = vpack.c.bf16 %v289_v51, %v288_v50  ;;  %v290_v53 = vld [vmem:[#allocation9 + $0x10] sm:$0xff]  ;;  %v292_v56 = vld [vmem:[#allocation9 + $0x20] sm:$0xff] }
  0x5f   :  { %626 = vmatprep.subr.bf16.mxu1 %v625_v20  ;;  %v291_v54 = vld [vmem:[#allocation9 + $0x18] sm:$0xff]  ;;  %v293_v57 = vld [vmem:[#allocation9 + $0x28] sm:$0xff]  ;;  %v294_v59 = vld [vmem:[#allocation9 + $0x30] sm:$0xff] }
  0x60   :  { %v649_v55 = vpack.c.bf16 %v291_v54, %v290_v53  ;;  %v653_v58 = vpack.c.bf16 %v293_v57, %v292_v56  ;;  %v295_v60 = vld [vmem:[#allocation9 + $0x38] sm:$0xff]  ;;  %v296_v62 = vld [vmem:[#allocation9 + $0x40] sm:$0xff]  ;;  %v297_v63 = vld [vmem:[#allocation9 + $0x48] sm:$0xff] }
  0x61   :  { %592 = vmatpush3.bf16.msra.mxu0 %v589_v23  ;;  %v657_v61 = vpack.c.bf16 %v295_v60, %v294_v59  ;;  %v661_v0 = vpack.c.bf16 %v297_v63, %v296_v62  ;;  %v298_v1 = vld [vmem:[#allocation9 + $0x50] sm:$0xff]  ;;  %v299_v2 = vld [vmem:[#allocation9 + $0x58] sm:$0xff]  ;;  %v300_v4 = vld [vmem:[#allocation9 + $0x60] sm:$0xff] }
  0x62   :  { %628 = vmatpush3.bf16.msra.mxu1 %v625_v20  ;;  %594 = vmatprep.subr.bf16.mxu0 %v593_v29  ;;  %v665_v3 = vpack.c.bf16 %v299_v2, %v298_v1  ;;  %v301_v5 = vld [vmem:[#allocation9 + $0x68] sm:$0xff]  ;;  %v302_v7 = vld [vmem:[#allocation9 + $0x70] sm:$0xff]  ;;  %v303_v8 = vld [vmem:[#allocation9 + $0x78] sm:$0xff] }
  0x63   :  { %630 = vmatprep.subr.bf16.mxu1 %v629_v26  ;;  %v669_v6 = vpack.c.bf16 %v301_v5, %v300_v4  ;;  %v673_v9 = vpack.c.bf16 %v303_v8, %v302_v7 }
  0x65   :  { %596 = vmatpush3.bf16.msra.mxu0 %v593_v29 }
  0x66   :  { %632 = vmatpush3.bf16.msra.mxu1 %v629_v26  ;;  %598 = vmatprep.subr.bf16.mxu0 %v597_v35  ;;  %v421_v26 = vld [vmem:[%s950_s4] ss:$0 sm:$0xff] }
  0x67   :  { %634 = vmatprep.subr.bf16.mxu1 %v633_v32 }
  0x69   :  { %600 = vmatpush3.bf16.msra.mxu0 %v597_v35 }
  0x6a   :  { %636 = vmatpush3.bf16.msra.mxu1 %v633_v32  ;;  %602 = vmatprep.subr.bf16.mxu0 %v601_v41 }
  0x6b   :  { %638 = vmatprep.subr.bf16.mxu1 %v637_v38 }
  0x6d   :  { %604 = vmatpush3.bf16.msra.mxu0 %v601_v41 }
  0x6e   :  { %640 = vmatpush3.bf16.msra.mxu1 %v637_v38  ;;  %606 = vmatprep.subr.bf16.mxu0 %v605_v45 }
  0x6f   :  { %642 = vmatprep.subr.bf16.mxu1 %v641_v44 }
  0x71   :  { %608 = vmatpush3.bf16.msra.mxu0 %v605_v45 }
  0x72   :  { %644 = vmatpush3.bf16.msra.mxu1 %v641_v44  ;;  %610 = vmatprep.subr.bf16.mxu0 %v609_v48 }
  0x75   :  { %544 = vmatmul.mubr.f32.vlgmr.msra.gmra.mrb[0].mxu1 %v87_v49  ;;  %612 = vmatpush3.bf16.msra.mxu0 %v609_v48 }
  0x76   :  { %646 = vmatprep.subr.bf16.mxu0 %v645_v52 }
  0x78   :  { %509 = vmatmul.mubr.f32.vlgmr.msra.gmra.mrb[0].mxu0 %v87_v49 }
  0x79   :  { %648 = vmatpush3.bf16.msra.mxu0 %v645_v52 }
  0x7a   :  { %650 = vmatprep.subr.bf16.mxu0 %v649_v55 }
  0x7d   :  { %652 = vmatpush3.bf16.msra.mxu0 %v649_v55 }
  0x7e   :  { %654 = vmatprep.subr.bf16.mxu0 %v653_v58 }
  0x81   :  { %656 = vmatpush3.bf16.msra.mxu0 %v653_v58 }
  0x82   :  { %658 = vmatprep.subr.bf16.mxu0 %v657_v61 }
  0x85   :  { %660 = vmatpush3.bf16.msra.mxu0 %v657_v61 }
  0x86   :  { %662 = vmatprep.subr.bf16.mxu0 %v661_v0 }
  0x89   :  { %664 = vmatpush3.bf16.msra.mxu0 %v661_v0 }
  0x8a   :  { %666 = vmatprep.subr.bf16.mxu0 %v665_v3 }
  0x8d   :  { %668 = vmatpush3.bf16.msra.mxu0 %v665_v3 }
  0x8e   :  { %670 = vmatprep.subr.bf16.mxu0 %v669_v6 }
  0x91   :  { %672 = vmatpush3.bf16.msra.mxu0 %v669_v6 }
  0x92   :  { %674 = vmatprep.subr.bf16.mxu0 %v673_v9 }
  0x95   :  { %676 = vmatpush3.bf16.msra.mxu0 %v673_v9 }
 0x148   :  { %v545_v10 = vpop.f32.mrb[0].mxu1 }
 0x149   :  { %v420_v11 = vmul.f32 -1.442695, %v545_v10  ;;  %v261_v12 = vpop.f32.mrb[1].mxu1 }
 0x14a   :  { %v419_v13 = vmul.f32 -1.442695, %v261_v12 }
 0x14b   :  { %685 = vpow2.f32 %v420_v11  ;;  %v510_v14 = vpop.f32.mrb[0].mxu0 }
 0x14c   :  { %687 = vpow2.f32 %v419_v13  ;;  %v170_v15 = vpop.f32.mrb[1].mxu0 }
 0x155   :  { %v686_v16 = vpop.eup %685 }
 0x156   :  { %v688_v17 = vpop.eup %687  ;;  %v277_v18 = vadd.f32 1.0, %v686_v16 }
 0x157   :  { %v276_v19 = vadd.f32 1.0, %v688_v17 }
 0x158   :  { %689 = vrcp.f32 %v277_v18 }
 0x159   :  { %691 = vrcp.f32 %v276_v19 }
 0x162   :  { %v690_v20 = vpop.eup %689 }
 0x163   :  { %v692_v21 = vpop.eup %691  ;;  %v283_v22 = vmul.f32 %v690_v20, %v545_v10 }
 0x164   :  { %v282_v23 = vmul.f32 %v692_v21, %v261_v12 }
 0x165   :  { %v285_v24 = vmul.f32 %v510_v14, %v283_v22 }
 0x166   :  { %v284_v25 = vmul.f32 %v282_v23, %v170_v15 }
 0x168   :  { %578 = vmatprep.mubr.f32.mxu0 %v284_v25 }
 0x169   :  { %579 = vmatmul.mubr.f32.vlgmr.msra.gmra.mrb[2].mxu0 %v285_v24 }
 0x23c   :  { %v580_v27 = vpop.f32.mrb[2].mxu0 }
 0x23d   :  { %v396_v28 = vadd.f32 %v580_v27, %v421_v26  ;;  %v370_v29 = vpop.f32.mrb[3].mxu0 }
 0x23e   :  { %v395_v30 = vadd.f32 %v421_v26, %v370_v29 }
 0x23f   :  { %398 = vst [vmem:[#allocation11 + $0x8] sm:$0xff] %v396_v28 }
 0x240   :  { %397 = vst [vmem:[#allocation11] sm:$0xff] %v395_v30 }
 0x241   :  { %795 = shalt.err (!%p792_p0)
}
 0x242   :  { %s796_s4 = scalar_lea.hbm %s951_s5, 256 }
 0x243   :  { %p797_p1 = scmp.ne.s32.totalorder %s951_s5, %s796_s4  ;;  %p800_p2 = scmp.lt.u32.totalorder %s796_s4, %s951_s5 }
 0x245   :  { %p802_p3 = pnand %p800_p2, %p797_p1 }
 0x247   :  { %805 = shalt.err (!%p802_p3)
}
 0x248   :  { %410 = dma.vmem_to_hbm [thread:$0]  %s405_s25, 256, %s951_s5, [#allocation5], %s817_s9, %s817_s9, %s818_s10  }
 0x249   :  { %812 = dma.done.wait [#allocation5], 256  }
 0x24a   :  { %813 = vsyncadd [#allocation5], 4294967040 }
 0x24b   :  { %414 = vsyncpa [#allocation4], 1 }
 0x24c   :  { %415 = vsyncpa [#allocation7], 1 }
 0x24d   :  { %416 = vsyncpa [#allocation10], 1 }
 0x24e   :  { %417 = vsyncpa [#allocation5], 1 }

</bundles_post_ra>
